<compile_context>
chip_gen: v7x
topology: tpu7x:2x2x1
jax: 0.10.0
libtpu: 0.0.40
codegen_flags: <defaults>
</compile_context>

<pallas_src>
import jax
import jax.numpy as jnp
from jax import lax
from jax.experimental import pallas as pl
from jax.experimental.pallas import tpu as pltpu


def _round_up(v, m):
    return (v + m - 1) // m * m


# ---------------------------------------------------------------------------
# Small-problem kernel: everything in VMEM, single MXU contraction.
# ---------------------------------------------------------------------------
def _linear_small_kernel(x_ref, w_ref, b_ref, o_ref):
    # Contract x's last dim with weight's last dim  ==  x @ W^T on the MXU,
    # so no transpose is materialized anywhere.
    acc = lax.dot_general(
        x_ref[...], w_ref[...],
        dimension_numbers=(((1,), (1,)), ((), ())),
        preferred_element_type=jnp.float32)
    o_ref[...] = (acc + b_ref[...].astype(jnp.float32)).astype(o_ref.dtype)


# ---------------------------------------------------------------------------
# Tiled kernel: f32 accumulator scratch, bias add only on the final K step.
# ---------------------------------------------------------------------------
def _linear_tiled_kernel(x_ref, w_ref, b_ref, o_ref, acc_ref):
    k = pl.program_id(2)

    @pl.when(k == 0)
    def _():
        acc_ref[...] = jnp.zeros_like(acc_ref)

    # (tm, tk) x (tn, tk) contracted over the tk axis -> (tm, tn); this is the
    # x @ W^T tile with the transpose folded into the MXU contraction.
    acc_ref[...] += lax.dot_general(
        x_ref[...], w_ref[...],
        dimension_numbers=(((1,), (1,)), ((), ())),
        preferred_element_type=jnp.float32)

    @pl.when(k == pl.num_programs(2) - 1)
    def _():
        # Broadcast bias add happens once per output tile, not per K step.
        o_ref[...] = (acc_ref[...] + b_ref[...].astype(jnp.float32)).astype(o_ref.dtype)


def linear_pallas(x, weight, bias, *,
                  tm=256, tn=512, tk=512,
                  compute_dtype=None,
                  small_bytes=4 * 1024 * 1024,
                  vmem_limit_bytes=64 * 1024 * 1024,
                  force_tiled=False):
    """Equivalent of torch.nn.Linear forward: y = x @ weight.T + bias.

    x:      (B, In)
    weight: (Out, In)   -- PyTorch layout, transpose folded into the kernel dot
    bias:   (Out,)
    returns (B, Out) in x.dtype
    """
    B, In = x.shape
    Out, In_w = weight.shape
    assert In == In_w, "weight must be (Out, In)"
    out_dtype = x.dtype

    # Optional bf16 operands (v6e/v7x MXU peak); accumulation stays f32.
    if compute_dtype is not None:
        x = x.astype(compute_dtype)
        weight = weight.astype(compute_dtype)

    b2 = bias.reshape(1, Out)

    total_bytes = ((x.size + weight.size + b2.size) * x.dtype.itemsize
                   + B * Out * jnp.dtype(out_dtype).itemsize)

    if not force_tiled and total_bytes <= small_bytes:
        # Toy sizes: skip the grid machinery entirely -- no grid loop, no
        # index maps, one VMEM-resident block and a single MXU pass.
        return pl.pallas_call(
            _linear_small_kernel,
            out_shape=jax.ShapeDtypeStruct((B, Out), out_dtype),
            in_specs=[
                pl.BlockSpec(memory_space=pltpu.MemorySpace.VMEM),
                pl.BlockSpec(memory_space=pltpu.MemorySpace.VMEM),
                pl.BlockSpec(memory_space=pltpu.MemorySpace.VMEM),
            ],
            out_specs=pl.BlockSpec(memory_space=pltpu.MemorySpace.VMEM),
        )(x, weight, b2)

    # ----------------------- tiled / scalable path --------------------------
    tm = min(tm, _round_up(B, 8))
    tn = min(tn, _round_up(Out, 128))   # lane-dense output stores
    tk = min(tk, _round_up(In, 128))

    Mp = _round_up(B, tm)
    Np = _round_up(Out, tn)
    Kp = _round_up(In, tk)

    xp = x if (Mp == B and Kp == In) else jnp.pad(x, ((0, Mp - B), (0, Kp - In)))
    wp = (weight if (Np == Out and Kp == In)
          else jnp.pad(weight, ((0, Np - Out), (0, Kp - In))))
    bp = b2 if Np == Out else jnp.pad(b2, ((0, 0), (0, Np - Out)))

    out_p = pl.pallas_call(
        _linear_tiled_kernel,
        out_shape=jax.ShapeDtypeStruct((Mp, Np), out_dtype),
        grid_spec=pltpu.PrefetchScalarGridSpec(
            num_scalar_prefetch=0,
            grid=(Mp // tm, Np // tn, Kp // tk),
            in_specs=[
                pl.BlockSpec((tm, tk), lambda i, j, k: (i, k)),  # x tile
                pl.BlockSpec((tn, tk), lambda i, j, k: (j, k)),  # W tile (no transpose)
                pl.BlockSpec((1, tn), lambda i, j, k: (0, j)),   # bias tile
            ],
            out_specs=pl.BlockSpec((tm, tn), lambda i, j, k: (i, j)),
            scratch_shapes=[pltpu.VMEM((tm, tn), jnp.float32)],
        ),
        compiler_params=pltpu.CompilerParams(
            dimension_semantics=("parallel", "parallel", "arbitrary"),
            vmem_limit_bytes=vmem_limit_bytes,
        ),
    )(xp, wp, bp)

    if Mp == B and Np == Out:
        return out_p
    return out_p[:B, :Out]


if __name__ == "__main__":
    # Small shapes consistent with the module: Model(input_size=32, output_size=16)
    input_size, output_size, batch = 32, 16, 8

    key = jax.random.PRNGKey(0)
    kx, kw, kb = jax.random.split(key, 3)

    # Deterministic parameter init (uniform, like nn.Linear's default range).
    bound = 1.0 / (input_size ** 0.5)
    weight = jax.random.uniform(kw, (output_size, input_size),
                                minval=-bound, maxval=bound, dtype=jnp.float32)
    bias = jax.random.uniform(kb, (output_size,),
                              minval=-bound, maxval=bound, dtype=jnp.float32)
    x = jax.random.normal(kx, (batch, input_size), dtype=jnp.float32)

    out = jax.block_until_ready(linear_pallas(x, weight, bias))

    # Mirrors the module's print of input/output sizes (host-side, like PyTorch).
    print("\tIn Model: input size", tuple(x.shape), "output size", tuple(out.shape))

    ref = x @ weight.T + bias
    assert jnp.allclose(out, ref, atol=1e-5, rtol=1e-5)

    # Also exercise the scalable tiled path (padding on M/N + K accumulation).
    k2 = jax.random.PRNGKey(1)
    kx2, kw2, kb2 = jax.random.split(k2, 3)
    B2, In2, Out2 = 384, 1024, 768
    bound2 = 1.0 / (In2 ** 0.5)
    w2 = jax.random.uniform(kw2, (Out2, In2), minval=-bound2, maxval=bound2,
                            dtype=jnp.float32)
    b2v = jax.random.uniform(kb2, (Out2,), minval=-bound2, maxval=bound2,
                             dtype=jnp.float32)
    x2 = jax.random.normal(kx2, (B2, In2), dtype=jnp.float32)

    out2 = jax.block_until_ready(linear_pallas(x2, w2, b2v, force_tiled=True))
    ref2 = jnp.dot(x2, w2.T, precision=lax.Precision.HIGHEST) + b2v
    assert out2.shape == (B2, Out2)
    assert jnp.allclose(out2, ref2, atol=1e-2, rtol=1e-2)

    print("KERNEL_OK")
</pallas_src>

<mosaic_0001>
module attributes {stable_mosaic.version = 11 : i64} {
  func.func @_linear_small_kernel(%arg0: memref<8x32xf32, #tpu.memory_space<vmem>>, %arg1: memref<16x32xf32, #tpu.memory_space<vmem>>, %arg2: memref<1x16xf32, #tpu.memory_space<vmem>>, %arg3: memref<8x16xf32, #tpu.memory_space<vmem>>) attributes {dimension_semantics = [], scalar_prefetch = 0 : i64, scratch_operands = 0 : i64, tpu.core_type = #tpu.core_type<tc>} {
    %c0 = arith.constant 0 : index
    %c0_0 = arith.constant 0 : index
    %0 = vector.load %arg0[%c0, %c0_0] : memref<8x32xf32, #tpu.memory_space<vmem>>, vector<8x32xf32>
    %c0_1 = arith.constant 0 : index
    %c0_2 = arith.constant 0 : index
    %1 = vector.load %arg1[%c0_1, %c0_2] : memref<16x32xf32, #tpu.memory_space<vmem>>, vector<16x32xf32>
    %cst = arith.constant dense<0.000000e+00> : vector<8x16xf32>
    %2 = tpu.matmul %0, %1, %cst {dimension_numbers = #tpu.dot_dimension_numbers<[1], [1], [0], [0], [0, 0, 1, 0], [], []>} : vector<8x32xf32>, vector<16x32xf32>, vector<8x16xf32> -> vector<8x16xf32>
    %c0_3 = arith.constant 0 : index
    %c0_4 = arith.constant 0 : index
    %3 = vector.load %arg2[%c0_3, %c0_4] : memref<1x16xf32, #tpu.memory_space<vmem>>, vector<1x16xf32>
    %4 = vector.broadcast %3 : vector<1x16xf32> to vector<8x16xf32>
    %5 = arith.addf %2, %4 : vector<8x16xf32>
    %c0_5 = arith.constant 0 : index
    %c0_6 = arith.constant 0 : index
    %6 = vector.load %arg3[%c0_5, %c0_6] : memref<8x16xf32, #tpu.memory_space<vmem>>, vector<8x16xf32>
    tpu.vector_store %arg3[%c0_5, %c0_6], %5 {strides = array<i32>} : memref<8x16xf32, #tpu.memory_space<vmem>>, vector<8x16xf32>,
    return
  }
}

</mosaic_0001>

<bundles_post_ra>
// kernel: tpu_custom_call.1
= control target key start
LH: loop header
LB: loop body
LE: loop exit
PB: predicated region body
PF: predicated region fallthrough
CT: control target
= control target key end

     0   :  { %8 = vsyncpa [#allocation3], 0  ;;  %s321_s0 = inlined_call_operand.hbm [shape: f32[8,32], index: 0, kind: input, shape index: {}]   ;;  %s322_s1 = inlined_call_operand.hbm [shape: f32[16,32], index: 1, kind: input, shape index: {}]   ;;  %s323_s2 = inlined_call_operand.vmem [shape: f32[1,16], index: 2, kind: input, shape index: {}]   ;;  %s324_s3 = inlined_call_operand.hbm [shape: f32[8,16], index: 3, kind: output, shape index: {}]  }
   0x1   :  { %9 = vsyncpa [#allocation6], 0 }
   0x2   :  { %10 = vsyncpa [#allocation4], 0  ;;  %s247_s12 = smov [#allocation2]   ;;  %s248_s14 = smov [#allocation5]  }
   0x3   :  { %s17_s13 = sshll.u32 %s247_s12, 4  ;;  %s26_s15 = sshll.u32 %s248_s14, 4  ;;  %s18_s13 = int_to_ptr.vmem [resolvable:$true] %s17_s13  ;;  %s275_s15 = int_to_ptr.vmem [resolvable:$true] %s26_s15 }
   0x4   :  { %s175_s18 = scalar_lea.hbm %s321_s0, 128 }
   0x5   :  { %p176_p0 = scmp.ne.s32.totalorder %s321_s0, %s175_s18  ;;  %p179_p1 = scmp.lt.u32.totalorder %s175_s18, %s321_s0 }
   0x7   :  { %p181_p2 = pnand %p179_p1, %p176_p0 }
   0x9   :  { %184 = shalt.err (!%p181_p2)
}
   0xa   :  { %s185_s23 = scalar_lea.vmem %s18_s13, 128  ;;  %p190_p4 = scmp.lt.s32.totalorder %s18_s13, %s18_s13 }
   0xb   :  { %p186_p3 = scmp.ne.s32.totalorder %s18_s13, %s185_s23  ;;  %p191_p5 = scmp.lt.s32.totalorder %s185_s23, %s185_s23 }
   0xd   :  { %p192_p6 = por %p191_p5, %p190_p4 }
   0xf   :  { %p193_p7 = pnand %p192_p6, %p186_p3 }
  0x11   :  { %196 = shalt.err (!%p193_p7)
}
  0x12   :  { %20 = dma.hbm_to_vmem [thread:$0]  %s321_s0, 128, %s18_s13, [#allocation3]  }
  0x13   :  { %s197_s28 = scalar_lea.hbm %s322_s1, 256 }
  0x14   :  { %p198_p8 = scmp.ne.s32.totalorder %s322_s1, %s197_s28  ;;  %p201_p9 = scmp.lt.u32.totalorder %s197_s28, %s322_s1 }
  0x16   :  { %p203_p10 = pnand %p201_p9, %p198_p8 }
  0x18   :  { %206 = shalt.err (!%p203_p10)
}
  0x19   :  { %s207_s6 = scalar_lea.vmem %s275_s15, 256  ;;  %p212_p12 = scmp.lt.s32.totalorder %s275_s15, %s275_s15 }
  0x1a   :  { %p208_p11 = scmp.ne.s32.totalorder %s275_s15, %s207_s6  ;;  %p213_p13 = scmp.lt.s32.totalorder %s207_s6, %s207_s6 }
  0x1c   :  { %p214_p0 = por %p213_p13, %p212_p12 }
  0x1e   :  { %p215_p1 = pnand %p214_p0, %p208_p11 }
  0x20   :  { %218 = shalt.err (!%p215_p1)
}
  0x21   :  { %s249_s0 = smov 128   ;;  %s250_s7 = smov 8  }
  0x22   :  { %32 = dma.hbm_to_vmem [thread:$0]  %s322_s1, 256, %s275_s15, [#allocation6], %s249_s0, %s249_s0, %s250_s7  }
  0x23   :  { %241 = dma.done.wait [#allocation3], 128  }
  0x24   :  { %242 = vsyncadd [#allocation3], 4294967168 }
  0x25   :  { %243 = dma.done.wait [#allocation6], 256  }
  0x26   :  { %244 = vsyncadd [#allocation6], 4294967040  ;;  %v251_v0 = vmov 0.0|0.0   ;;  %vm252_vm0 = vmmov 0   ;;  %v253_v1 = vmov 0.0   ;;  %vm51_vm1 = vcmask 261120  }
  0x27   :  { %163 = vmatprep.subr.bf16.mxu0 %v251_v0  ;;  %160 = vmatprep.mubr.msk.f32.mxu0 %vm252_vm0, %v253_v1  ;;  %v42_v2 = vld [vmem:[#allocation5] sm:$0xff]  ;;  %v43_v3 = vld [vmem:[#allocation5 + $0x8] sm:$0xff]  ;;  %vm165_vm2 = vmpackc.low %vm51_vm1, %vm51_vm1  ;;  %s254_s1 = smov [#allocation7]   ;;  %vm131_vm3 = vcmask 130048  }
  0x28   :  { %v164_v4 = vpack.c.bf16 %v43_v3, %v42_v2  ;;  %v41_v5 = vld [vmem:[#allocation2] sm:$0xff]  ;;  %s139_s12 = sshll.u32 %s254_s1, 4  ;;  %s140_s12 = int_to_ptr.vmem [resolvable:$true] %s139_s12 }
  0x29   :  { %v149_v6 = vld [vmem:[%s323_s2] ss:$0 sm:$0xff]  ;;  %s219_s13 = scalar_lea.vmem %s140_s12, 128  ;;  %p224_p3 = scmp.lt.s32.totalorder %s140_s12, %s140_s12 }
  0x2a   :  { %166 = vmatpush3.bf16.xpose.msk.msra.mxu0 %vm165_vm2, %v164_v4  ;;  %p220_p2 = scmp.ne.s32.totalorder %s140_s12, %s219_s13  ;;  %p225_p4 = scmp.lt.s32.totalorder %s219_s13, %s219_s13 }
  0x2c   :  { %p226_p5 = por %p225_p4, %p224_p3 }
  0x2e   :  { %p227_p6 = pnand %p226_p5, %p220_p2 }
  0x31   :  { %161 = vmatmul.mubr.msk.f32.vlgmr.msra.gmra.mrb[0].mxu0 %vm51_vm1, %v41_v5 }
 0x104   :  { %v127_v7 = vpop.f32.mrb[0].mxu0 }
 0x105   :  { %v128_v8 = vadd.f32 %v149_v6, %v127_v7  ;;  %v162_v9 = vpop.f32.mrb[1].mxu0 }
 0x107   :  { %132 = vst.msk [vmem:[#allocation7] sm:$0xff] %vm131_vm3, %v128_v8 }
 0x108   :  { %230 = shalt.err (!%p227_p6)
}
 0x109   :  { %s231_s16 = scalar_lea.hbm %s324_s3, 128 }
 0x10a   :  { %p232_p7 = scmp.ne.s32.totalorder %s324_s3, %s231_s16  ;;  %p235_p8 = scmp.lt.u32.totalorder %s231_s16, %s324_s3 }
 0x10c   :  { %p237_p9 = pnand %p235_p8, %p232_p7 }
 0x10e   :  { %240 = shalt.err (!%p237_p9)
}
 0x10f   :  { %142 = dma.vmem_to_hbm [thread:$0]  %s140_s12, 128, %s324_s3, [#allocation4]  }
 0x110   :  { %245 = dma.done.wait [#allocation4], 128  }
 0x111   :  { %246 = vsyncadd [#allocation4], 4294967168 }
 0x112   :  { %146 = vsyncpa [#allocation3], 1 }
 0x113   :  { %147 = vsyncpa [#allocation6], 1 }
 0x114   :  { %148 = vsyncpa [#allocation4], 1 }

</bundles_post_ra>
